<compile_context>
chip_gen: v7x
topology: tpu7x:2x2x1
jax: 0.10.0
libtpu: 0.0.40
codegen_flags: <defaults>
</compile_context>

<pallas_src>
import math
import numpy as np
import jax
import jax.numpy as jnp
from jax.experimental import pallas as pl
from jax.experimental.pallas import tpu as pltpu

EMBEDDING_SIZE = 32
FF_DIMENSION = 64
Q_SIZE = 8
K_SIZE = 8
V_SIZE = 8
N_HEAD = 4

BATCH = 2
SEQ = 8


# ----------------------------------------------------------------------------
# constants baked into the weight slabs
# ----------------------------------------------------------------------------
def _gather_matrix():
    """One-hot matrix implementing the reference's head-split reshape.

    Applied to the (H*B*L, 3*D) column-chunk stack of [q2|k2|v2] it yields the
    per-(b,h,l) head-split rows:  out[(b*H+h)*L + l, :] = x3[b, h, l, :].
    """
    B, L, H, D = BATCH, SEQ, N_HEAD, Q_SIZE
    g = np.zeros((B * H * L, H * B * L), np.float32)
    for b in range(B):
        for h in range(H):
            for l in range(L):
                flat = (h * L + l) * D                  # d = 0
                src_row = flat // (H * D)               # row of the (L, H*D) proj
                src_chunk = (flat % (H * D)) // D       # D-wide column chunk
                g[(b * H + h) * L + l, src_chunk * B * L + b * L + src_row] = 1.0
    return jnp.asarray(g)


def _block_diag_mask():
    """(H*L, H*D) 0/1 mask selecting the per-head diagonal blocks."""
    return jnp.asarray(np.kron(np.eye(N_HEAD, dtype=np.float32),
                               np.ones((SEQ, V_SIZE), np.float32)))


# ----------------------------------------------------------------------------
# the single fused kernel
# ----------------------------------------------------------------------------
def _decoder_layer_kernel(de_ref, enc_ref, mask_ref, w32_ref, w64_ref, bias_ref,
                          o_ref):
    f32 = jnp.float32
    B, L, E = BATCH, SEQ, EMBEDDING_SIZE
    H, D, FF = N_HEAD, Q_SIZE, FF_DIMENSION
    BL, HD, HL = B * L, H * D, H * L

    de = de_ref[...]                                 # (BL, E) query + residual
    enc = enc_ref[...]                               # (BL, E) key/value input

    # ---- static slices from the two consolidated weight slabs ---------------
    wq = w32_ref[0:E, :]                             # (E, HD)
    wo = w32_ref[E:2 * E, :]                         # (HD, E)
    w2 = w32_ref[2 * E:2 * E + FF, :]                # (FF, E)
    bd = w32_ref[2 * E + FF:2 * E + FF + HL, :]      # (HL, HD) block-diag mask
    wkv = w64_ref[0:E, :]                            # (E, 2*HD)  [W_K | W_V]
    w1 = w64_ref[E:2 * E, :]                         # (E, FF)
    gmat = w64_ref[2 * E:2 * E + B * HL, :]          # (B*H*L, H*B*L) one-hot

    bq = bias_ref[0:1, 0:HD]
    bkv = bias_ref[1:2, 0:2 * HD]
    bo = bias_ref[2:3, 0:E]
    g1 = bias_ref[3:4, 0:E]
    be1 = bias_ref[4:5, 0:E]
    b1 = bias_ref[5:6, 0:FF]
    b2 = bias_ref[6:7, 0:E]
    g2 = bias_ref[7:8, 0:E]
    be2 = bias_ref[8:9, 0:E]

    # ---- Q / K / V projections: two MXU pushes, no wasted rows --------------
    q2 = jnp.dot(de, wq, preferred_element_type=f32) + bq          # (BL, HD)
    kv2 = jnp.dot(enc, wkv, preferred_element_type=f32) + bkv      # (BL, 2*HD)

    # ---- fused head-split gather (the reference's quirky reshape) -----------
    # one (H*BL, 3*D) column-chunk stack + ONE one-hot matmul for q|k|v.
    pieces = []
    for c in range(H):                               # H == HD // D chunks
        pieces.append(jnp.concatenate(
            [q2[:, c * D:(c + 1) * D],
             kv2[:, c * D:(c + 1) * D],
             kv2[:, HD + c * D:HD + (c + 1) * D]], axis=1))        # (BL, 3*D)
    stack = jnp.concatenate(pieces, axis=0)                         # (H*BL, 3*D)
    qkv3 = jnp.dot(gmat, stack, preferred_element_type=f32)        # rows (b,h,l)

    # ---- per-batch lane-dense attention (block-diagonal K / V) --------------
    scale = 1.0 / math.sqrt(K_SIZE)
    outs = []
    for b in range(B):
        blk = qkv3[b * HL:(b + 1) * HL, :]                          # (H*L, 3*D)
        # queries in merged (l, h*D+d) layout -> output rows come out merged
        qr = jnp.concatenate(
            [blk[h * L:(h + 1) * L, 0:D] for h in range(H)], axis=1)  # (L, HD)
        k3 = blk[:, D:2 * D]                                        # (H*L, D)
        v3 = blk[:, 2 * D:3 * D]                                    # (H*L, D)
        kbd = jnp.concatenate([k3] * H, axis=1) * bd                # (H*L, HD)
        vbd = jnp.concatenate([v3] * H, axis=1) * bd                # (H*L, HD)

        # scores: (L, H*L), columns indexed (head, key position)
        sc = jax.lax.dot_general(qr, kbd, (((1,), (1,)), ((), ())),
                                 preferred_element_type=f32) * scale
        msk = mask_ref[b * L:(b + 1) * L, :]                        # (L, H*L)
        sc = jnp.where(msk > 0.0, -1000000000.0, sc)                # masked_fill

        # softmax over the HEAD axis (columns spaced L apart) -- reference quirk
        parts = [sc[:, h * L:(h + 1) * L] for h in range(H)]
        mx = parts[0]
        for sp in parts[1:]:
            mx = jnp.maximum(mx, sp)
        e = jnp.exp(sc - jnp.concatenate([mx] * H, axis=1))
        eparts = [e[:, h * L:(h + 1) * L] for h in range(H)]
        den = eparts[0]
        for ep in eparts[1:]:
            den = den + ep
        inv = pl.reciprocal(den, approx=False)                      # exact, EUP
        probs = e * jnp.concatenate([inv] * H, axis=1)              # (L, H*L)

        # P @ block-diag(V) directly yields the merged (L, H*D) slab
        outs.append(jnp.dot(probs, vbd, preferred_element_type=f32))
    merged = jnp.concatenate(outs, axis=0)                          # (BL, HD)

    def layer_norm(y, g, be):
        mu = jnp.mean(y, axis=-1, keepdims=True)
        cent = y - mu
        var = jnp.mean(cent * cent, axis=-1, keepdims=True)
        return cent * jax.lax.rsqrt(var + 1e-5) * g + be

    # ---- attention output projection + residual + LayerNorm -----------------
    attn = jnp.dot(merged, wo, preferred_element_type=f32) + bo
    attn = layer_norm(attn + de, g1, be1)

    # ---- position-wise FFN (Conv1d k=1 == matmul), residual, LayerNorm ------
    hid = jnp.dot(attn, w1, preferred_element_type=f32) + b1
    ffo = jnp.dot(hid, w2, preferred_element_type=f32) + b2
    o_ref[...] = layer_norm(ffo + attn, g2, be2)


# ----------------------------------------------------------------------------
# wrapper
# ----------------------------------------------------------------------------
def pack_params(params):
    """Fuse the per-module parameters into three consolidated operand slabs."""
    mha, ffn = params['mha'], params['ffn']
    w32 = jnp.concatenate([mha['wq'], mha['wo'], ffn['w2'], _block_diag_mask()],
                          axis=0)                                   # (160, 32)
    wkv = jnp.concatenate([mha['wk'], mha['wv']], axis=1)           # (32, 64)
    w64 = jnp.concatenate([wkv, ffn['w1'], _gather_matrix()], axis=0)  # (128, 64)

    def row64(v):
        return jnp.pad(v, (0, 64 - v.shape[0])).reshape(1, 64)

    bias = jnp.concatenate([
        row64(mha['bq']),
        row64(jnp.concatenate([mha['bk'], mha['bv']])),
        row64(mha['bo']),
        row64(mha['ln_g']), row64(mha['ln_b']),
        row64(ffn['b1']), row64(ffn['b2']),
        row64(ffn['ln_g']), row64(ffn['ln_b'])], axis=0)            # (9, 64)
    return dict(w32=w32, w64=w64, bias=bias)


def decoder_layer(packed, de_embed, encoder_output, attn_mask, attn_mask_mask):
    B, L, E = de_embed.shape
    assert (B, L, E) == (BATCH, SEQ, EMBEDDING_SIZE)
    # The reference computes mask_Mutil_attn(...) with gt(attn_mask +
    # attn_mask_mask, 0) but never uses the result: dead code, dropped.
    del attn_mask_mask

    de2 = de_embed.reshape(B * L, E)
    enc2 = encoder_output.reshape(B * L, E)
    # mask pre-tiled across heads: (B*L, H*L), 1.0 == masked
    maskt = jnp.tile((attn_mask > 0).astype(jnp.float32).reshape(B * L, L),
                     (1, N_HEAD))

    out2d = pl.pallas_call(
        _decoder_layer_kernel,
        out_shape=jax.ShapeDtypeStruct((B * L, E), jnp.float32),
        in_specs=[pl.BlockSpec(memory_space=pltpu.MemorySpace.VMEM)] * 6,
        out_specs=pl.BlockSpec(memory_space=pltpu.MemorySpace.VMEM),
    )(de2, enc2, maskt, packed['w32'], packed['w64'], packed['bias'])
    return out2d.reshape(B, L, E)


# ----------------------------------------------------------------------------
# parameter init (torch-Linear-style)
# ----------------------------------------------------------------------------
def _lin_init(key, fan_in, fan_out):
    k1, k2 = jax.random.split(key)
    bound = 1.0 / math.sqrt(fan_in)
    w = jax.random.uniform(k1, (fan_in, fan_out), jnp.float32, -bound, bound)
    b = jax.random.uniform(k2, (fan_out,), jnp.float32, -bound, bound)
    return w, b


def _mha_init(keys):
    wq, bq = _lin_init(keys[0], EMBEDDING_SIZE, Q_SIZE * N_HEAD)
    wk, bk = _lin_init(keys[1], EMBEDDING_SIZE, K_SIZE * N_HEAD)
    wv, bv = _lin_init(keys[2], EMBEDDING_SIZE, V_SIZE * N_HEAD)
    wo, bo = _lin_init(keys[3], Q_SIZE * N_HEAD, EMBEDDING_SIZE)
    return dict(wq=wq, bq=bq, wk=wk, bk=bk, wv=wv, bv=bv, wo=wo, bo=bo,
                ln_g=jnp.ones((EMBEDDING_SIZE,), jnp.float32),
                ln_b=jnp.zeros((EMBEDDING_SIZE,), jnp.float32))


def init_params(key):
    keys = jax.random.split(key, 10)
    w1, b1 = _lin_init(keys[8], EMBEDDING_SIZE, FF_DIMENSION)
    w2, b2 = _lin_init(keys[9], FF_DIMENSION, EMBEDDING_SIZE)
    return {
        # 'mask_mha' exists in the reference module but its output is unused;
        # kept only for interface fidelity (not fed to the fused kernel).
        'mask_mha': _mha_init(keys[0:4]),
        'mha': _mha_init(keys[4:8]),
        'ffn': dict(w1=w1, b1=b1, w2=w2, b2=b2,
                    ln_g=jnp.ones((EMBEDDING_SIZE,), jnp.float32),
                    ln_b=jnp.zeros((EMBEDDING_SIZE,), jnp.float32)),
    }


# ----------------------------------------------------------------------------
# pure-JAX reference (mirrors the PyTorch module) for a numerical self-check
# ----------------------------------------------------------------------------
def _layer_norm_ref(x, g, b):
    mu = jnp.mean(x, axis=-1, keepdims=True)
    var = jnp.mean((x - mu) ** 2, axis=-1, keepdims=True)
    return (x - mu) / jnp.sqrt(var + 1e-5) * g + b


def reference_forward(params, de_embed, encoder_output, attn_mask):
    mha, ffn = params['mha'], params['ffn']
    B, L, E = de_embed.shape
    H, D = N_HEAD, Q_SIZE
    hp = jax.lax.Precision.HIGHEST

    def lin(x, w, b):
        y = jnp.dot(x.reshape(-1, x.shape[-1]), w, precision=hp)
        return y.reshape(x.shape[:-1] + (w.shape[1],)) + b

    q_in, kv_in = de_embed, encoder_output
    s_q = lin(q_in, mha['wq'], mha['bq']).reshape(B, H, L, D)   # quirky reshape
    s_k = lin(kv_in, mha['wk'], mha['bk']).reshape(B, H, L, D)
    s_v = lin(kv_in, mha['wv'], mha['bv']).reshape(B, H, L, D)
    mask = (attn_mask > 0)[:, None, :, :]
    score = jnp.einsum('bhld,bhmd->bhlm', s_q, s_k, precision=hp) / np.sqrt(K_SIZE)
    score = jnp.where(mask, -1000000000.0, score)
    score = jax.nn.softmax(score, axis=1)                       # HEAD-axis softmax
    ctx = jnp.einsum('bhlm,bhmd->bhld', score, s_v, precision=hp)
    merged = jnp.transpose(ctx, (0, 2, 1, 3)).reshape(B, L, H * D)
    attn = lin(merged, mha['wo'], mha['bo']) + q_in
    attn = _layer_norm_ref(attn, mha['ln_g'], mha['ln_b'])
    hid = lin(attn, ffn['w1'], ffn['b1'])
    ffo = lin(hid, ffn['w2'], ffn['b2'])
    return _layer_norm_ref(ffo + attn, ffn['ln_g'], ffn['ln_b'])


# ----------------------------------------------------------------------------
if __name__ == "__main__":
    key = jax.random.PRNGKey(0)
    kp, k1, k2 = jax.random.split(key, 3)
    params = init_params(kp)
    packed = pack_params(params)

    de_embed = jax.random.normal(k1, (BATCH, SEQ, EMBEDDING_SIZE), jnp.float32)
    encoder_output = jax.random.normal(k2, (BATCH, SEQ, EMBEDDING_SIZE),
                                       jnp.float32)

    # pad mask: last two key positions are padding (masked)
    pad = (jnp.arange(SEQ) >= SEQ - 2)
    attn_mask = jnp.broadcast_to(
        pad[None, None, :], (BATCH, SEQ, SEQ)).astype(jnp.int32)
    # "subsequent" (causal) mask -- only feeds the dead branch in the reference
    attn_mask_mask = jnp.broadcast_to(
        jnp.triu(jnp.ones((SEQ, SEQ), jnp.int32), k=1)[None],
        (BATCH, SEQ, SEQ))

    fwd = jax.jit(decoder_layer)
    out = fwd(packed, de_embed, encoder_output, attn_mask, attn_mask_mask)
    jax.block_until_ready(out)

    ref = reference_forward(params, de_embed, encoder_output, attn_mask)
    assert out.shape == (BATCH, SEQ, EMBEDDING_SIZE)
    assert bool(jnp.all(jnp.isfinite(out)))
    np.testing.assert_allclose(np.asarray(out), np.asarray(ref),
                               rtol=1e-3, atol=1e-3)
    print("KERNEL_OK")
</pallas_src>

<mosaic_0001>
module attributes {stable_mosaic.version = 11 : i64} {
  func.func @_decoder_layer_kernel(%arg0: memref<16x32xf32, #tpu.memory_space<vmem>>, %arg1: memref<16x32xf32, #tpu.memory_space<vmem>>, %arg2: memref<16x32xf32, #tpu.memory_space<vmem>>, %arg3: memref<160x32xf32, #tpu.memory_space<vmem>>, %arg4: memref<128x64xf32, #tpu.memory_space<vmem>>, %arg5: memref<9x64xf32, #tpu.memory_space<vmem>>, %arg6: memref<16x32xf32, #tpu.memory_space<vmem>>) attributes {dimension_semantics = [], scalar_prefetch = 0 : i64, scratch_operands = 0 : i64, tpu.core_type = #tpu.core_type<tc>} {
    %c0 = arith.constant 0 : index
    %c0_0 = arith.constant 0 : index
    %0 = vector.load %arg0[%c0, %c0_0] : memref<16x32xf32, #tpu.memory_space<vmem>>, vector<16x32xf32>
    %c0_1 = arith.constant 0 : index
    %c0_2 = arith.constant 0 : index
    %1 = vector.load %arg1[%c0_1, %c0_2] : memref<16x32xf32, #tpu.memory_space<vmem>>, vector<16x32xf32>
    %c0_3 = arith.constant 0 : index
    %c0_4 = arith.constant 0 : index
    %2 = vector.load %arg3[%c0_3, %c0_4] : memref<160x32xf32, #tpu.memory_space<vmem>>, vector<32x32xf32>
    %c32 = arith.constant 32 : index
    %c0_5 = arith.constant 0 : index
    %3 = vector.load %arg3[%c32, %c0_5] : memref<160x32xf32, #tpu.memory_space<vmem>>, vector<32x32xf32>
    %c64 = arith.constant 64 : index
    %c0_6 = arith.constant 0 : index
    %4 = vector.load %arg3[%c64, %c0_6] : memref<160x32xf32, #tpu.memory_space<vmem>>, vector<64x32xf32>
    %c128 = arith.constant 128 : index
    %c0_7 = arith.constant 0 : index
    %5 = vector.load %arg3[%c128, %c0_7] : memref<160x32xf32, #tpu.memory_space<vmem>>, vector<32x32xf32>
    %c0_8 = arith.constant 0 : index
    %c0_9 = arith.constant 0 : index
    %6 = vector.load %arg4[%c0_8, %c0_9] : memref<128x64xf32, #tpu.memory_space<vmem>>, vector<32x64xf32>
    %c32_10 = arith.constant 32 : index
    %c0_11 = arith.constant 0 : index
    %7 = vector.load %arg4[%c32_10, %c0_11] : memref<128x64xf32, #tpu.memory_space<vmem>>, vector<32x64xf32>
    %c64_12 = arith.constant 64 : index
    %c0_13 = arith.constant 0 : index
    %8 = vector.load %arg4[%c64_12, %c0_13] : memref<128x64xf32, #tpu.memory_space<vmem>>, vector<64x64xf32>
    %c0_14 = arith.constant 0 : index
    %c0_15 = arith.constant 0 : index
    %9 = vector.load %arg5[%c0_14, %c0_15] : memref<9x64xf32, #tpu.memory_space<vmem>>, vector<1x32xf32>
    %c1 = arith.constant 1 : index
    %c0_16 = arith.constant 0 : index
    %10 = vector.load %arg5[%c1, %c0_16] : memref<9x64xf32, #tpu.memory_space<vmem>>, vector<1x64xf32>
    %c2 = arith.constant 2 : index
    %c0_17 = arith.constant 0 : index
    %11 = vector.load %arg5[%c2, %c0_17] : memref<9x64xf32, #tpu.memory_space<vmem>>, vector<1x32xf32>
    %c3 = arith.constant 3 : index
    %c0_18 = arith.constant 0 : index
    %12 = vector.load %arg5[%c3, %c0_18] : memref<9x64xf32, #tpu.memory_space<vmem>>, vector<1x32xf32>
    %c4 = arith.constant 4 : index
    %c0_19 = arith.constant 0 : index
    %13 = vector.load %arg5[%c4, %c0_19] : memref<9x64xf32, #tpu.memory_space<vmem>>, vector<1x32xf32>
    %c5 = arith.constant 5 : index
    %c0_20 = arith.constant 0 : index
    %14 = vector.load %arg5[%c5, %c0_20] : memref<9x64xf32, #tpu.memory_space<vmem>>, vector<1x64xf32>
    %c6 = arith.constant 6 : index
    %c0_21 = arith.constant 0 : index
    %15 = vector.load %arg5[%c6, %c0_21] : memref<9x64xf32, #tpu.memory_space<vmem>>, vector<1x32xf32>
    %c7 = arith.constant 7 : index
    %c0_22 = arith.constant 0 : index
    %16 = vector.load %arg5[%c7, %c0_22] : memref<9x64xf32, #tpu.memory_space<vmem>>, vector<1x32xf32>
    %c8 = arith.constant 8 : index
    %c0_23 = arith.constant 0 : index
    %17 = vector.load %arg5[%c8, %c0_23] : memref<9x64xf32, #tpu.memory_space<vmem>>, vector<1x32xf32>
    %cst = arith.constant dense<0.000000e+00> : vector<16x32xf32>
    %18 = tpu.matmul %0, %2, %cst {dimension_numbers = #tpu.dot_dimension_numbers<[1], [0], [0], [1], [0, 0, 1, 1], [], []>} : vector<16x32xf32>, vector<32x32xf32>, vector<16x32xf32> -> vector<16x32xf32>
    %19 = vector.broadcast %9 : vector<1x32xf32> to vector<16x32xf32>
    %20 = arith.addf %18, %19 : vector<16x32xf32>
    %cst_24 = arith.constant dense<0.000000e+00> : vector<16x64xf32>
    %21 = tpu.matmul %1, %6, %cst_24 {dimension_numbers = #tpu.dot_dimension_numbers<[1], [0], [0], [1], [0, 0, 1, 1], [], []>} : vector<16x32xf32>, vector<32x64xf32>, vector<16x64xf32> -> vector<16x64xf32>
    %22 = vector.broadcast %10 : vector<1x64xf32> to vector<16x64xf32>
    %23 = arith.addf %21, %22 : vector<16x64xf32>
    %24 = vector.extract_strided_slice %20 {offsets = [0, 0], sizes = [16, 8], strides = [1, 1]} : vector<16x32xf32> to vector<16x8xf32>
    %25 = vector.extract_strided_slice %23 {offsets = [0, 0], sizes = [16, 8], strides = [1, 1]} : vector<16x64xf32> to vector<16x8xf32>
    %26 = vector.extract_strided_slice %23 {offsets = [0, 32], sizes = [16, 8], strides = [1, 1]} : vector<16x64xf32> to vector<16x8xf32>
    %27 = tpu.concatenate %24, %25, %26 in 1 : vector<16x8xf32>, vector<16x8xf32>, vector<16x8xf32> -> vector<16x24xf32>
    %28 = vector.extract_strided_slice %20 {offsets = [0, 8], sizes = [16, 8], strides = [1, 1]} : vector<16x32xf32> to vector<16x8xf32>
    %29 = vector.extract_strided_slice %23 {offsets = [0, 8], sizes = [16, 8], strides = [1, 1]} : vector<16x64xf32> to vector<16x8xf32>
    %30 = vector.extract_strided_slice %23 {offsets = [0, 40], sizes = [16, 8], strides = [1, 1]} : vector<16x64xf32> to vector<16x8xf32>
    %31 = tpu.concatenate %28, %29, %30 in 1 : vector<16x8xf32>, vector<16x8xf32>, vector<16x8xf32> -> vector<16x24xf32>
    %32 = vector.extract_strided_slice %20 {offsets = [0, 16], sizes = [16, 8], strides = [1, 1]} : vector<16x32xf32> to vector<16x8xf32>
    %33 = vector.extract_strided_slice %23 {offsets = [0, 16], sizes = [16, 8], strides = [1, 1]} : vector<16x64xf32> to vector<16x8xf32>
    %34 = vector.extract_strided_slice %23 {offsets = [0, 48], sizes = [16, 8], strides = [1, 1]} : vector<16x64xf32> to vector<16x8xf32>
    %35 = tpu.concatenate %32, %33, %34 in 1 : vector<16x8xf32>, vector<16x8xf32>, vector<16x8xf32> -> vector<16x24xf32>
    %36 = vector.extract_strided_slice %20 {offsets = [0, 24], sizes = [16, 8], strides = [1, 1]} : vector<16x32xf32> to vector<16x8xf32>
    %37 = vector.extract_strided_slice %23 {offsets = [0, 24], sizes = [16, 8], strides = [1, 1]} : vector<16x64xf32> to vector<16x8xf32>
    %38 = vector.extract_strided_slice %23 {offsets = [0, 56], sizes = [16, 8], strides = [1, 1]} : vector<16x64xf32> to vector<16x8xf32>
    %39 = tpu.concatenate %36, %37, %38 in 1 : vector<16x8xf32>, vector<16x8xf32>, vector<16x8xf32> -> vector<16x24xf32>
    %40 = tpu.concatenate %27, %31, %35, %39 in 0 : vector<16x24xf32>, vector<16x24xf32>, vector<16x24xf32>, vector<16x24xf32> -> vector<64x24xf32>
    %cst_25 = arith.constant dense<0.000000e+00> : vector<64x24xf32>
    %41 = tpu.matmul %8, %40, %cst_25 {dimension_numbers = #tpu.dot_dimension_numbers<[1], [0], [0], [1], [0, 0, 1, 1], [], []>} : vector<64x64xf32>, vector<64x24xf32>, vector<64x24xf32> -> vector<64x24xf32>
    %42 = vector.extract_strided_slice %41 {offsets = [0, 0], sizes = [32, 24], strides = [1, 1]} : vector<64x24xf32> to vector<32x24xf32>
    %43 = vector.extract_strided_slice %42 {offsets = [0, 0], sizes = [8, 8], strides = [1, 1]} : vector<32x24xf32> to vector<8x8xf32>
    %44 = vector.extract_strided_slice %42 {offsets = [8, 0], sizes = [8, 8], strides = [1, 1]} : vector<32x24xf32> to vector<8x8xf32>
    %45 = vector.extract_strided_slice %42 {offsets = [16, 0], sizes = [8, 8], strides = [1, 1]} : vector<32x24xf32> to vector<8x8xf32>
    %46 = vector.extract_strided_slice %42 {offsets = [24, 0], sizes = [8, 8], strides = [1, 1]} : vector<32x24xf32> to vector<8x8xf32>
    %47 = tpu.concatenate %43, %44, %45, %46 in 1 : vector<8x8xf32>, vector<8x8xf32>, vector<8x8xf32>, vector<8x8xf32> -> vector<8x32xf32>
    %48 = vector.extract_strided_slice %42 {offsets = [0, 8], sizes = [32, 8], strides = [1, 1]} : vector<32x24xf32> to vector<32x8xf32>
    %49 = vector.extract_strided_slice %42 {offsets = [0, 16], sizes = [32, 8], strides = [1, 1]} : vector<32x24xf32> to vector<32x8xf32>
    %50 = tpu.concatenate %48, %48, %48, %48 in 1 : vector<32x8xf32>, vector<32x8xf32>, vector<32x8xf32>, vector<32x8xf32> -> vector<32x32xf32>
    %51 = arith.mulf %50, %5 : vector<32x32xf32>
    %52 = tpu.concatenate %49, %49, %49, %49 in 1 : vector<32x8xf32>, vector<32x8xf32>, vector<32x8xf32>, vector<32x8xf32> -> vector<32x32xf32>
    %53 = arith.mulf %52, %5 : vector<32x32xf32>
    %cst_26 = arith.constant dense<0.000000e+00> : vector<8x32xf32>
    %54 = tpu.matmul %47, %51, %cst_26 {dimension_numbers = #tpu.dot_dimension_numbers<[1], [1], [0], [0], [0, 0, 1, 0], [], []>} : vector<8x32xf32>, vector<32x32xf32>, vector<8x32xf32> -> vector<8x32xf32>
    %cst_27 = arith.constant 0.353553385 : f32
    %55 = vector.broadcast %cst_27 : f32 to vector<8x32xf32>
    %56 = arith.mulf %54, %55 : vector<8x32xf32>
    %c0_28 = arith.constant 0 : index
    %c0_29 = arith.constant 0 : index
    %57 = vector.load %arg2[%c0_28, %c0_29] : memref<16x32xf32, #tpu.memory_space<vmem>>, vector<8x32xf32>
    %cst_30 = arith.constant 0.000000e+00 : f32
    %58 = vector.broadcast %cst_30 : f32 to vector<8x32xf32>
    %59 = arith.cmpf ogt, %57, %58 : vector<8x32xf32>
    %cst_31 = arith.constant -1.000000e+09 : f32
    %60 = vector.broadcast %cst_31 : f32 to vector<8x32xf32>
    %61 = arith.select %59, %60, %56 : vector<8x32xi1>, vector<8x32xf32>
    %62 = vector.extract_strided_slice %61 {offsets = [0, 0], sizes = [8, 8], strides = [1, 1]} : vector<8x32xf32> to vector<8x8xf32>
    %63 = vector.extract_strided_slice %61 {offsets = [0, 8], sizes = [8, 8], strides = [1, 1]} : vector<8x32xf32> to vector<8x8xf32>
    %64 = vector.extract_strided_slice %61 {offsets = [0, 16], sizes = [8, 8], strides = [1, 1]} : vector<8x32xf32> to vector<8x8xf32>
    %65 = vector.extract_strided_slice %61 {offsets = [0, 24], sizes = [8, 8], strides = [1, 1]} : vector<8x32xf32> to vector<8x8xf32>
    %66 = arith.maximumf %62, %63 : vector<8x8xf32>
    %67 = arith.maximumf %66, %64 : vector<8x8xf32>
    %68 = arith.maximumf %67, %65 : vector<8x8xf32>
    %69 = tpu.concatenate %68, %68, %68, %68 in 1 : vector<8x8xf32>, vector<8x8xf32>, vector<8x8xf32>, vector<8x8xf32> -> vector<8x32xf32>
    %70 = arith.subf %61, %69 : vector<8x32xf32>
    %71 = math.exp %70 : vector<8x32xf32>
    %72 = vector.extract_strided_slice %71 {offsets = [0, 0], sizes = [8, 8], strides = [1, 1]} : vector<8x32xf32> to vector<8x8xf32>
    %73 = vector.extract_strided_slice %71 {offsets = [0, 8], sizes = [8, 8], strides = [1, 1]} : vector<8x32xf32> to vector<8x8xf32>
    %74 = vector.extract_strided_slice %71 {offsets = [0, 16], sizes = [8, 8], strides = [1, 1]} : vector<8x32xf32> to vector<8x8xf32>
    %75 = vector.extract_strided_slice %71 {offsets = [0, 24], sizes = [8, 8], strides = [1, 1]} : vector<8x32xf32> to vector<8x8xf32>
    %76 = arith.addf %72, %73 : vector<8x8xf32>
    %77 = arith.addf %76, %74 : vector<8x8xf32>
    %78 = arith.addf %77, %75 : vector<8x8xf32>
    %79 = tpu.reciprocal %78 : vector<8x8xf32> -> vector<8x8xf32>
    %80 = tpu.concatenate %79, %79, %79, %79 in 1 : vector<8x8xf32>, vector<8x8xf32>, vector<8x8xf32>, vector<8x8xf32> -> vector<8x32xf32>
    %81 = arith.mulf %71, %80 : vector<8x32xf32>
    %cst_32 = arith.constant dense<0.000000e+00> : vector<8x32xf32>
    %82 = tpu.matmul %81, %53, %cst_32 {dimension_numbers = #tpu.dot_dimension_numbers<[1], [0], [0], [1], [0, 0, 1, 1], [], []>} : vector<8x32xf32>, vector<32x32xf32>, vector<8x32xf32> -> vector<8x32xf32>
    %83 = vector.extract_strided_slice %41 {offsets = [32, 0], sizes = [32, 24], strides = [1, 1]} : vector<64x24xf32> to vector<32x24xf32>
    %84 = vector.extract_strided_slice %83 {offsets = [0, 0], sizes = [8, 8], strides = [1, 1]} : vector<32x24xf32> to vector<8x8xf32>
    %85 = vector.extract_strided_slice %83 {offsets = [8, 0], sizes = [8, 8], strides = [1, 1]} : vector<32x24xf32> to vector<8x8xf32>
    %86 = vector.extract_strided_slice %83 {offsets = [16, 0], sizes = [8, 8], strides = [1, 1]} : vector<32x24xf32> to vector<8x8xf32>
    %87 = vector.extract_strided_slice %83 {offsets = [24, 0], sizes = [8, 8], strides = [1, 1]} : vector<32x24xf32> to vector<8x8xf32>
    %88 = tpu.concatenate %84, %85, %86, %87 in 1 : vector<8x8xf32>, vector<8x8xf32>, vector<8x8xf32>, vector<8x8xf32> -> vector<8x32xf32>
    %89 = vector.extract_strided_slice %83 {offsets = [0, 8], sizes = [32, 8], strides = [1, 1]} : vector<32x24xf32> to vector<32x8xf32>
    %90 = vector.extract_strided_slice %83 {offsets = [0, 16], sizes = [32, 8], strides = [1, 1]} : vector<32x24xf32> to vector<32x8xf32>
    %91 = tpu.concatenate %89, %89, %89, %89 in 1 : vector<32x8xf32>, vector<32x8xf32>, vector<32x8xf32>, vector<32x8xf32> -> vector<32x32xf32>
    %92 = arith.mulf %91, %5 : vector<32x32xf32>
    %93 = tpu.concatenate %90, %90, %90, %90 in 1 : vector<32x8xf32>, vector<32x8xf32>, vector<32x8xf32>, vector<32x8xf32> -> vector<32x32xf32>
    %94 = arith.mulf %93, %5 : vector<32x32xf32>
    %cst_33 = arith.constant dense<0.000000e+00> : vector<8x32xf32>
    %95 = tpu.matmul %88, %92, %cst_33 {dimension_numbers = #tpu.dot_dimension_numbers<[1], [1], [0], [0], [0, 0, 1, 0], [], []>} : vector<8x32xf32>, vector<32x32xf32>, vector<8x32xf32> -> vector<8x32xf32>
    %cst_34 = arith.constant 0.353553385 : f32
    %96 = vector.broadcast %cst_34 : f32 to vector<8x32xf32>
    %97 = arith.mulf %95, %96 : vector<8x32xf32>
    %c8_35 = arith.constant 8 : index
    %c0_36 = arith.constant 0 : index
    %98 = vector.load %arg2[%c8_35, %c0_36] : memref<16x32xf32, #tpu.memory_space<vmem>>, vector<8x32xf32>
    %cst_37 = arith.constant 0.000000e+00 : f32
    %99 = vector.broadcast %cst_37 : f32 to vector<8x32xf32>
    %100 = arith.cmpf ogt, %98, %99 : vector<8x32xf32>
    %cst_38 = arith.constant -1.000000e+09 : f32
    %101 = vector.broadcast %cst_38 : f32 to vector<8x32xf32>
    %102 = arith.select %100, %101, %97 : vector<8x32xi1>, vector<8x32xf32>
    %103 = vector.extract_strided_slice %102 {offsets = [0, 0], sizes = [8, 8], strides = [1, 1]} : vector<8x32xf32> to vector<8x8xf32>
    %104 = vector.extract_strided_slice %102 {offsets = [0, 8], sizes = [8, 8], strides = [1, 1]} : vector<8x32xf32> to vector<8x8xf32>
    %105 = vector.extract_strided_slice %102 {offsets = [0, 16], sizes = [8, 8], strides = [1, 1]} : vector<8x32xf32> to vector<8x8xf32>
    %106 = vector.extract_strided_slice %102 {offsets = [0, 24], sizes = [8, 8], strides = [1, 1]} : vector<8x32xf32> to vector<8x8xf32>
    %107 = arith.maximumf %103, %104 : vector<8x8xf32>
    %108 = arith.maximumf %107, %105 : vector<8x8xf32>
    %109 = arith.maximumf %108, %106 : vector<8x8xf32>
    %110 = tpu.concatenate %109, %109, %109, %109 in 1 : vector<8x8xf32>, vector<8x8xf32>, vector<8x8xf32>, vector<8x8xf32> -> vector<8x32xf32>
    %111 = arith.subf %102, %110 : vector<8x32xf32>
    %112 = math.exp %111 : vector<8x32xf32>
    %113 = vector.extract_strided_slice %112 {offsets = [0, 0], sizes = [8, 8], strides = [1, 1]} : vector<8x32xf32> to vector<8x8xf32>
    %114 = vector.extract_strided_slice %112 {offsets = [0, 8], sizes = [8, 8], strides = [1, 1]} : vector<8x32xf32> to vector<8x8xf32>
    %115 = vector.extract_strided_slice %112 {offsets = [0, 16], sizes = [8, 8], strides = [1, 1]} : vector<8x32xf32> to vector<8x8xf32>
    %116 = vector.extract_strided_slice %112 {offsets = [0, 24], sizes = [8, 8], strides = [1, 1]} : vector<8x32xf32> to vector<8x8xf32>
    %117 = arith.addf %113, %114 : vector<8x8xf32>
    %118 = arith.addf %117, %115 : vector<8x8xf32>
    %119 = arith.addf %118, %116 : vector<8x8xf32>
    %120 = tpu.reciprocal %119 : vector<8x8xf32> -> vector<8x8xf32>
    %121 = tpu.concatenate %120, %120, %120, %120 in 1 : vector<8x8xf32>, vector<8x8xf32>, vector<8x8xf32>, vector<8x8xf32> -> vector<8x32xf32>
    %122 = arith.mulf %112, %121 : vector<8x32xf32>
    %cst_39 = arith.constant dense<0.000000e+00> : vector<8x32xf32>
    %123 = tpu.matmul %122, %94, %cst_39 {dimension_numbers = #tpu.dot_dimension_numbers<[1], [0], [0], [1], [0, 0, 1, 1], [], []>} : vector<8x32xf32>, vector<32x32xf32>, vector<8x32xf32> -> vector<8x32xf32>
    %124 = tpu.concatenate %82, %123 in 0 : vector<8x32xf32>, vector<8x32xf32> -> vector<16x32xf32>
    %cst_40 = arith.constant dense<0.000000e+00> : vector<16x32xf32>
    %125 = tpu.matmul %124, %3, %cst_40 {dimension_numbers = #tpu.dot_dimension_numbers<[1], [0], [0], [1], [0, 0, 1, 1], [], []>} : vector<16x32xf32>, vector<32x32xf32>, vector<16x32xf32> -> vector<16x32xf32>
    %126 = vector.broadcast %11 : vector<1x32xf32> to vector<16x32xf32>
    %127 = arith.addf %125, %126 : vector<16x32xf32>
    %128 = arith.addf %127, %0 : vector<16x32xf32>
    %cst_41 = arith.constant dense<0.000000e+00> : vector<16xf32>
    %129 = vector.multi_reduction <add>, %128, %cst_41 [1] : vector<16x32xf32> to vector<16xf32>
    %130 = vector.shape_cast %129 : vector<16xf32> to vector<16x1xf32>
    %cst_42 = arith.constant 3.200000e+01 : f32
    %131 = vector.broadcast %cst_42 : f32 to vector<16x1xf32>
    %132 = arith.divf %130, %131 : vector<16x1xf32>
    %133 = vector.broadcast %132 : vector<16x1xf32> to vector<16x32xf32>
    %134 = arith.subf %128, %133 : vector<16x32xf32>
    %135 = arith.mulf %134, %134 : vector<16x32xf32>
    %cst_43 = arith.constant dense<0.000000e+00> : vector<16xf32>
    %136 = vector.multi_reduction <add>, %135, %cst_43 [1] : vector<16x32xf32> to vector<16xf32>
    %137 = vector.shape_cast %136 : vector<16xf32> to vector<16x1xf32>
    %cst_44 = arith.constant 3.200000e+01 : f32
    %138 = vector.broadcast %cst_44 : f32 to vector<16x1xf32>
    %139 = arith.divf %137, %138 : vector<16x1xf32>
    %cst_45 = arith.constant 9.99999974E-6 : f32
    %140 = vector.broadcast %cst_45 : f32 to vector<16x1xf32>
    %141 = arith.addf %139, %140 : vector<16x1xf32>
    %142 = math.rsqrt %141 : vector<16x1xf32>
    %143 = vector.broadcast %142 : vector<16x1xf32> to vector<16x32xf32>
    %144 = arith.mulf %134, %143 : vector<16x32xf32>
    %145 = vector.broadcast %12 : vector<1x32xf32> to vector<16x32xf32>
    %146 = arith.mulf %144, %145 : vector<16x32xf32>
    %147 = vector.broadcast %13 : vector<1x32xf32> to vector<16x32xf32>
    %148 = arith.addf %146, %147 : vector<16x32xf32>
    %cst_46 = arith.constant dense<0.000000e+00> : vector<16x64xf32>
    %149 = tpu.matmul %148, %7, %cst_46 {dimension_numbers = #tpu.dot_dimension_numbers<[1], [0], [0], [1], [0, 0, 1, 1], [], []>} : vector<16x32xf32>, vector<32x64xf32>, vector<16x64xf32> -> vector<16x64xf32>
    %150 = vector.broadcast %14 : vector<1x64xf32> to vector<16x64xf32>
    %151 = arith.addf %149, %150 : vector<16x64xf32>
    %cst_47 = arith.constant dense<0.000000e+00> : vector<16x32xf32>
    %152 = tpu.matmul %151, %4, %cst_47 {dimension_numbers = #tpu.dot_dimension_numbers<[1], [0], [0], [1], [0, 0, 1, 1], [], []>} : vector<16x64xf32>, vector<64x32xf32>, vector<16x32xf32> -> vector<16x32xf32>
    %153 = vector.broadcast %15 : vector<1x32xf32> to vector<16x32xf32>
    %154 = arith.addf %152, %153 : vector<16x32xf32>
    %155 = arith.addf %154, %148 : vector<16x32xf32>
    %cst_48 = arith.constant dense<0.000000e+00> : vector<16xf32>
    %156 = vector.multi_reduction <add>, %155, %cst_48 [1] : vector<16x32xf32> to vector<16xf32>
    %157 = vector.shape_cast %156 : vector<16xf32> to vector<16x1xf32>
    %cst_49 = arith.constant 3.200000e+01 : f32
    %158 = vector.broadcast %cst_49 : f32 to vector<16x1xf32>
    %159 = arith.divf %157, %158 : vector<16x1xf32>
    %160 = vector.broadcast %159 : vector<16x1xf32> to vector<16x32xf32>
    %161 = arith.subf %155, %160 : vector<16x32xf32>
    %162 = arith.mulf %161, %161 : vector<16x32xf32>
    %cst_50 = arith.constant dense<0.000000e+00> : vector<16xf32>
    %163 = vector.multi_reduction <add>, %162, %cst_50 [1] : vector<16x32xf32> to vector<16xf32>
    %164 = vector.shape_cast %163 : vector<16xf32> to vector<16x1xf32>
    %cst_51 = arith.constant 3.200000e+01 : f32
    %165 = vector.broadcast %cst_51 : f32 to vector<16x1xf32>
    %166 = arith.divf %164, %165 : vector<16x1xf32>
    %cst_52 = arith.constant 9.99999974E-6 : f32
    %167 = vector.broadcast %cst_52 : f32 to vector<16x1xf32>
    %168 = arith.addf %166, %167 : vector<16x1xf32>
    %169 = math.rsqrt %168 : vector<16x1xf32>
    %170 = vector.broadcast %169 : vector<16x1xf32> to vector<16x32xf32>
    %171 = arith.mulf %161, %170 : vector<16x32xf32>
    %172 = vector.broadcast %16 : vector<1x32xf32> to vector<16x32xf32>
    %173 = arith.mulf %171, %172 : vector<16x32xf32>
    %174 = vector.broadcast %17 : vector<1x32xf32> to vector<16x32xf32>
    %175 = arith.addf %173, %174 : vector<16x32xf32>
    %c0_53 = arith.constant 0 : index
    %c0_54 = arith.constant 0 : index
    %176 = vector.load %arg6[%c0_53, %c0_54] : memref<16x32xf32, #tpu.memory_space<vmem>>, vector<16x32xf32>
    tpu.vector_store %arg6[%c0_53, %c0_54], %175 {strides = array<i32>} : memref<16x32xf32, #tpu.memory_space<vmem>>, vector<16x32xf32>,
    return
  }
}

</mosaic_0001>

<bundles_post_ra>
// kernel: decoder_layer.1
= control target key start
LH: loop header
LB: loop body
LE: loop exit
PB: predicated region body
PF: predicated region fallthrough
CT: control target
= control target key end

     0   :  { %vm77_vm0 = vcmask 261120   ;;  %s2460_s0 = inlined_call_operand.vmem [shape: f32[16,32], index: 0, kind: input, shape index: {}]   ;;  %s2461_s1 = inlined_call_operand.vmem [shape: f32[16,32], index: 1, kind: input, shape index: {}]   ;;  %s2462_s2 = inlined_call_operand.vmem [shape: f32[16,32], index: 2, kind: input, shape index: {}]   ;;  %s2463_s3 = inlined_call_operand.vmem [shape: f32[160,32], index: 3, kind: input, shape index: {}]   ;;  %s2464_s4 = inlined_call_operand.vmem [shape: f32[128,64], index: 4, kind: input, shape index: {}]   ;;  %s2465_s5 = inlined_call_operand.vmem [shape: f32[9,64], index: 5, kind: input, shape index: {}]   ;;  %s2466_s6 = inlined_call_operand.hbm [shape: f32[16,32], index: 6, kind: output, shape index: {}]  }
   0x1   :  { %v28_v0 = vld [vmem:[%s2463_s3] sm:$0xff]  ;;  %v29_v1 = vld [vmem:[%s2463_s3 + $0x8] sm:$0xff]  ;;  %v30_v2 = vld [vmem:[%s2463_s3 + $0x10] sm:$0xff] }
   0x2   :  { %v1667_v3 = vpack.c.bf16 %v29_v1, %v28_v0  ;;  %v31_v4 = vld [vmem:[%s2463_s3 + $0x18] sm:$0xff]  ;;  %v1920_v5 = vld [vmem:[%s2460_s0] sm:$0xff]  ;;  %v49_v8 = vld [vmem:[%s2464_s4 + $0x8] sm:$0xff] }
   0x3   :  { %v1671_v6 = vpack.c.bf16 %v31_v4, %v30_v2  ;;  %1540 = vmatprep.mubr.msk.f32.mxu1 %vm77_vm0, %v1920_v5  ;;  %v48_v7 = vld [vmem:[%s2464_s4] sm:$0xff] }
   0x4   :  { %1668 = vmatprep.subr.bf16.mxu1 %v1667_v3 }
   0x5   :  { %1670 = vmatpush3.bf16.msra.mxu1 %v1667_v3 }
   0x6   :  { %11 = vsyncpa [#allocation3], 0  ;;  %1672 = vmatprep.subr.bf16.mxu1 %v1671_v6  ;;  %v1675_v9 = vpack.c.bf16 %v49_v8, %v48_v7  ;;  %v50_v10 = vld [vmem:[%s2464_s4 + $0x10] sm:$0xff]  ;;  %v51_v11 = vld [vmem:[%s2464_s4 + $0x18] sm:$0xff]  ;;  %s1857_s22 = smov 120   ;;  %s1859_s25 = smov 104  }
   0x7   :  { %v1939_v12 = vld [vmem:[%s2460_s0 + $0x8] sm:$0xff]  ;;  %v1679_v13 = vpack.c.bf16 %v51_v11, %v50_v10  ;;  %v26_v14 = vld [vmem:[%s2461_s1] sm:$0xff]  ;;  %s1860_s26 = smov 112   ;;  %vm320_vm1 = vcmask 523264   ;;  %s1861_s29 = smov 96   ;;  %vm258_vm2 = vcmask 64512   ;;  %vm2124_vm6 = vmpackc.low %vm77_vm0, %vm77_vm0 }
   0x8   :  { %v27_v15 = vld [vmem:[%s2461_s1 + $0x8] sm:$0xff]  ;;  %v1423_v16 = vld [vmem:[%s2465_s5] ss:$0 sm:$0xff]  ;;  %v1426_v22 = vld [vmem:[%s2465_s5 + $0x1] ss:$0 sm:$0xff]  ;;  %s1858_s1 = smov 8  }
   0x9   :  { %1674 = vmatpush3.bf16.msra.mxu1 %v1671_v6  ;;  %v56_v28 = vld [vmem:[%s2464_s4 + $0x40] sm:$0xff]  ;;  %s1862_s30 = smov 88   ;;  %vm261_vm3 = vcmask 130048   ;;  %s1864_s0 = smov 16   ;;  %vm1865_vm4 = vmmov 0   ;;  %vm464_vm5 = vcmask 195584  }
   0xa   :  { %1676 = vmatprep.subr.bf16.mxu1 %v1675_v9  ;;  %1570 = vmatprep.mubr.msk.f32.mxu0 %vm320_vm1, %v56_v28  ;;  %s1867_s21 = smov 24  }
   0xc   :  { %1541 = vmatmul.mubr.msk.f32.vlgmr.msra.gmra.mrb[0].mxu1 %vm77_vm0, %v1939_v12 }
   0xd   :  { %1678 = vmatpush3.bf16.msra.mxu1 %v1675_v9  ;;  %1551 = vmatprep.mubr.msk.f32.mxu1 %vm77_vm0, %v26_v14  ;;  %v57_v14 = vld [vmem:[%s2464_s4 + $0x48] sm:$0xff] }
   0xe   :  { %1680 = vmatprep.subr.bf16.mxu1 %v1679_v13 }
  0x11   :  { %1682 = vmatpush3.bf16.msra.mxu1 %v1679_v13 }
  0x14   :  { %1552 = vmatmul.mubr.msk.f32.vlgmr.msra.gmra.mrb[2].mxu1 %vm77_vm0, %v27_v15  ;;  %v58_v15 = vld [vmem:[%s2464_s4 + $0x50] sm:$0xff] }
  0xdf   :  { %v1542_v17 = vpop.f32.mrb[0].mxu1 }
  0xe0   :  { %v156_v18 = vadd.f32 %v1542_v17, %v1423_v16  ;;  %v150_v19 = vpop.f32.mrb[1].mxu1  ;;  %v60_v17 = vld [vmem:[%s2464_s4 + $0x60] sm:$0xff] }
  0xe1   :  { %v151_v20 = vadd.f32 %v1423_v16, %v150_v19  ;;  %v59_v16 = vld [vmem:[%s2464_s4 + $0x58] sm:$0xff]  ;;  %v62_v19 = vld [vmem:[%s2464_s4 + $0x70] sm:$0xff] }
  0xe3   :  { %v1772_v21 = vpack.i.bf16 %v156_v18, %v151_v20 }
  0xe5   :  { %1773 = vrot.lane.b32.xlu1 %v1772_v21, %s1857_s22 }
  0xe7   :  { %v1553_v23 = vpop.f32.mrb[2].mxu1 }
  0xe8   :  { %v241_v24 = vadd.f32 %v1553_v23, %v1426_v22  ;;  %v235_v25 = vpop.f32.mrb[3].mxu1  ;;  %v1863_v23 = vmov 0.0|0.0  }
  0xe9   :  { %v236_v26 = vadd.f32 %v1426_v22, %v235_v25  ;;  %1699 = vmatprep.subr.bf16.mxu1 %v1863_v23 }
  0xeb   :  { %v1777_v27 = vpack.i.bf16 %v241_v24, %v236_v26 }
  0xed   :  { %1778 = vrot.lane.b32.xlu0 %v1777_v27, %s1858_s1  ;;  %1793 = vrot.lane.b32.xlu1 %v1777_v27, %s1859_s25 }
  0xf1   :  { %1783 = vrot.lane.b32.xlu0 %v1777_v27, %s1860_s26  ;;  %1798 = vrot.lane.b32.xlu1 %v1777_v27, %s1857_s22 }
  0xf5   :  { %1788 = vrot.lane.b32.xlu0 %v1772_v21, %s1860_s26  ;;  %1803 = vrot.lane.b32.xlu1 %v1772_v21, %s1859_s25 }
  0xf9   :  { %1808 = vrot.lane.b32.xlu0 %v1777_v27, %s1861_s29  ;;  %s1868_s29 = smov [#allocation2]  }
  0xfd   :  { %1813 = vrot.lane.b32.xlu0 %v1777_v27, %s1862_s30  ;;  %s1412_s30 = sshll.u32 %s1868_s29, 4  ;;  %s1413_s30 = int_to_ptr.vmem [resolvable:$true] %s1412_s30 }
  0xfe   :  { %s1833_s7 = scalar_lea.vmem %s1413_s30, 256  ;;  %p1838_p1 = scmp.lt.s32.totalorder %s1413_s30, %s1413_s30 }
  0xff   :  { %p1834_p0 = scmp.ne.s32.totalorder %s1413_s30, %s1833_s7  ;;  %p1839_p2 = scmp.lt.s32.totalorder %s1833_s7, %s1833_s7 }
 0x101   :  { %p1840_p3 = por %p1839_p2, %p1838_p1 }
 0x103   :  { %p1841_p4 = pnand %p1840_p3, %p1834_p0 }
 0x157   :  { %v1774_v29 = vpop.permute.xlu1 %1773 }
 0x158   :  { %v1776_v32 = vunpack.i.h.bf16 %v1774_v29  ;;  %v1775_v33 = vunpack.i.l.bf16 %v1774_v29 }
 0x15a   :  { %v279_v42 = vsel %vm258_vm2, %v1776_v32, %v241_v24  ;;  %v278_v43 = vsel %vm258_vm2, %v1775_v33, %v236_v26 }
 0x15f   :  { %v1779_v30 = vpop.permute.xlu0 %1778  ;;  %v1794_v31 = vpop.permute.xlu1 %1793 }
 0x160   :  { %v1781_v34 = vunpack.i.h.bf16 %v1779_v30  ;;  %v1780_v35 = vunpack.i.l.bf16 %v1779_v30  ;;  %v1796_v36 = vunpack.i.h.bf16 %v1794_v31  ;;  %v1795_v37 = vunpack.i.l.bf16 %v1794_v31 }
 0x161   :  { %v1866_v30 = vmov 0.0  }
 0x162   :  { %v259_v44 = vsel %vm258_vm2, %v151_v20, %v1780_v35  ;;  %v260_v45 = vsel %vm258_vm2, %v156_v18, %v1781_v34  ;;  %v280_v48 = vsel %vm261_vm3, %v278_v43, %v1795_v37  ;;  %v281_v49 = vsel %vm261_vm3, %v279_v42, %v1796_v36  ;;  %v61_v18 = vld [vmem:[%s2464_s4 + $0x68] sm:$0xff]  ;;  %v63_v20 = vld [vmem:[%s2464_s4 + $0x78] sm:$0xff]  ;;  %1590 = vmatprep.mubr.msk.f32.mxu1 %vm1865_vm4, %v1866_v30 }
 0x163   :  { %v1784_v38 = vpop.permute.xlu0 %1783  ;;  %v1799_v41 = vpop.permute.xlu1 %1798  ;;  %v1687_v54 = vpack.c.bf16 %v281_v49, %v280_v48  ;;  %v2100_v37 = vld [vmem:[%s2463_s3 + $0x88] sm:$0xff] }
 0x164   :  { %v1786_v39 = vunpack.i.h.bf16 %v1784_v38  ;;  %v1785_v40 = vunpack.i.l.bf16 %v1784_v38  ;;  %v1801_v56 = vunpack.i.h.bf16 %v1799_v41  ;;  %v1800_v57 = vunpack.i.l.bf16 %v1799_v41  ;;  %v2111_v41 = vld [vmem:[%s2463_s3 + $0x80] sm:$0xff] }
 0x166   :  { %v262_v46 = vsel %vm261_vm3, %v259_v44, %v1785_v40  ;;  %v263_v47 = vsel %vm261_vm3, %v260_v45, %v1786_v39 }
 0x167   :  { %v1789_v50 = vpop.permute.xlu0 %1788  ;;  %v1683_v51 = vpack.c.bf16 %v263_v47, %v262_v46  ;;  %v1804_v55 = vpop.permute.xlu1 %1803 }
 0x168   :  { %v1791_v52 = vunpack.i.h.bf16 %v1789_v50  ;;  %v1790_v53 = vunpack.i.l.bf16 %v1789_v50  ;;  %v1806_v63 = vunpack.i.h.bf16 %v1804_v55  ;;  %v1805_v0 = vunpack.i.l.bf16 %v1804_v55  ;;  %v2144_v55 = vld [vmem:[%s2463_s3 + $0x98] sm:$0xff] }
 0x169   :  { %1684 = vmatprep.subr.bf16.mxu0 %v1683_v51 }
 0x16a   :  { %1686 = vmatpush3.bf16.msra.mxu0 %v1683_v51  ;;  %v300_v61 = vsel %vm258_vm2, %v1790_v53, %v1800_v57  ;;  %v301_v62 = vsel %vm258_vm2, %v1791_v52, %v1801_v56  ;;  %v317_v8 = vsel %vm258_vm2, %v1806_v63, %v1786_v39  ;;  %v316_v9 = vsel %vm258_vm2, %v1805_v0, %v1785_v40  ;;  %v2149_v56 = vld [vmem:[%s2463_s3 + $0x90] sm:$0xff] }
 0x16b   :  { %v1809_v58 = vpop.permute.xlu0 %1808  ;;  %1688 = vmatprep.subr.bf16.mxu0 %v1687_v54 }
 0x16c   :  { %v1811_v59 = vunpack.i.h.bf16 %v1809_v58  ;;  %v1810_v60 = vunpack.i.l.bf16 %v1809_v58 }
 0x16e   :  { %1690 = vmatpush3.bf16.msra.mxu0 %v1687_v54  ;;  %v302_v1 = vsel %vm261_vm3, %v300_v61, %v1810_v60  ;;  %v303_v2 = vsel %vm261_vm3, %v301_v62, %v1811_v59 }
 0x16f   :  { %v1814_v3 = vpop.permute.xlu0 %1813  ;;  %v1691_v4 = vpack.c.bf16 %v303_v2, %v302_v1 }
 0x170   :  { %v1816_v6 = vunpack.i.h.bf16 %v1814_v3  ;;  %v1815_v7 = vunpack.i.l.bf16 %v1814_v3 }
 0x171   :  { %1692 = vmatprep.subr.bf16.mxu0 %v1691_v4 }
 0x172   :  { %1694 = vmatpush3.bf16.msra.mxu0 %v1691_v4  ;;  %v318_v10 = vsel %vm261_vm3, %v316_v9, %v1815_v7  ;;  %v319_v11 = vsel %vm261_vm3, %v317_v8, %v1816_v6 }
 0x173   :  { %v1695_v13 = vpack.c.bf16 %v319_v11, %v318_v10 }
 0x175   :  { %1696 = vmatprep.subr.bf16.mxu0 %v1695_v13 }
 0x176   :  { %1698 = vmatpush3.bf16.msra.mxu0 %v1695_v13 }
 0x177   :  { %1713 = vmatprep.subr.bf16.mxu0 %v1863_v23 }
 0x179   :  { %1571 = vmatmul.mubr.msk.f32.vlgmr.msra.gmra.mrb[0].mxu0 %vm320_vm1, %v57_v14 }
 0x17a   :  { %1573 = vmatprep.mubr.msk.f32.mxu0 %vm320_vm1, %v58_v15 }
 0x17d   :  { %1574 = vmatmul.mubr.msk.f32.gmra.mrb[2].mxu0 %vm320_vm1, %v59_v16 }
 0x17e   :  { %1576 = vmatprep.mubr.msk.f32.mxu0 %vm320_vm1, %v60_v17 }
 0x181   :  { %1577 = vmatmul.mubr.msk.f32.gmra.mrb[4].mxu0 %vm320_vm1, %v61_v18 }
 0x182   :  { %1579 = vmatprep.mubr.msk.f32.mxu0 %vm320_vm1, %v62_v19 }
 0x185   :  { %1580 = vmatmul.mubr.msk.f32.gmra.mrb[6].mxu0 %vm320_vm1, %v63_v20 }
 0x186   :  { %1612 = vmatprep.mubr.msk.f32.mxu0 %vm1865_vm4, %v1866_v30 }
 0x24c   :  { %v2012_v21 = vpop.f32.mrb[0].mxu0 }
 0x24d   :  { %451 = vrot.lane.b32.xlu1 %v2012_v21, %s1858_s1  ;;  %469 = vrot.lane.b32.xlu0 %v2012_v21, %s1857_s22  ;;  %v2018_v22 = vpop.f32.mrb[1].mxu0 }
 0x250   :  { %v2022_v24 = vpop.f32.mrb[2].mxu0 }
 0x251   :  { %490 = vrot.lane.b32.xlu0 %v2012_v21, %s1864_s0  ;;  %467 = vrot.lane.b32.xlu1 %v2018_v22, %s1857_s22  ;;  %v2028_v25 = vpop.f32.mrb[3].mxu0 }
 0x254   :  { %v2030_v26 = vpop.f32.mrb[4].mxu0 }
 0x255   :  { %479 = vrot.lane.b32.xlu0 %v2018_v22, %s1858_s1  ;;  %488 = vrot.lane.b32.xlu1 %v2018_v22, %s1864_s0  ;;  %v2036_v27 = vpop.f32.mrb[5].mxu0 }
 0x258   :  { %v2038_v28 = vpop.f32.mrb[6].mxu0 }
 0x259   :  { %473 = vrot.lane.b32.xlu0 %v2022_v24, %s1857_s22  ;;  %471 = vrot.lane.b32.xlu1 %v2028_v25, %s1857_s22  ;;  %v2044_v29 = vpop.f32.mrb[7].mxu0 }
 0x25d   :  { %483 = vrot.lane.b32.xlu0 %v2022_v24, %s1858_s1  ;;  %481 = vrot.lane.b32.xlu1 %v2028_v25, %s1858_s1 }
 0x261   :  { %492 = vrot.lane.b32.xlu0 %v2022_v24, %s1864_s0  ;;  %455 = vrot.lane.b32.xlu1 %v2028_v25, %s1864_s0 }
 0x265   :  { %761 = vrot.lane.b32.xlu1 %v2030_v26, %s1858_s1  ;;  %778 = vrot.lane.b32.xlu0 %v2030_v26, %s1857_s22 }
 0x269   :  { %799 = vrot.lane.b32.xlu0 %v2030_v26, %s1864_s0  ;;  %776 = vrot.lane.b32.xlu1 %v2036_v27, %s1857_s22 }
 0x26d   :  { %788 = vrot.lane.b32.xlu0 %v2036_v27, %s1858_s1  ;;  %797 = vrot.lane.b32.xlu1 %v2036_v27, %s1864_s0 }
 0x271   :  { %782 = vrot.lane.b32.xlu0 %v2038_v28, %s1857_s22  ;;  %780 = vrot.lane.b32.xlu1 %v2044_v29, %s1857_s22 }
 0x275   :  { %792 = vrot.lane.b32.xlu0 %v2038_v28, %s1858_s1  ;;  %790 = vrot.lane.b32.xlu1 %v2044_v29, %s1858_s1 }
 0x279   :  { %801 = vrot.lane.b32.xlu0 %v2038_v28, %s1864_s0  ;;  %765 = vrot.lane.b32.xlu1 %v2044_v29, %s1864_s0 }
 0x27d   :  { %769 = vrot.lane.b32.xlu0 %v2038_v28, %s1867_s21  ;;  %459 = vrot.lane.b32.xlu1 %v2022_v24, %s1867_s21 }
 0x2bf   :  { %v2086_v31 = vpop.permute.xlu1 %451  ;;  %v2088_v32 = vpop.permute.xlu0 %469 }
 0x2c0   :  { %v498_v33 = vsel %vm258_vm2, %v2088_v32, %v2012_v21 }
 0x2c1   :  { %v502_v36 = vsel %vm261_vm3, %v498_v33, %v2086_v31 }
 0x2c3   :  { %v491_v34 = vpop.permute.xlu0 %490  ;;  %v2093_v35 = vpop.permute.xlu1 %467 }
 0x2c4   :  { %v506_v38 = vsel %vm464_vm5, %v502_v36, %v491_v34  ;;  %v497_v39 = vsel %vm258_vm2, %v2093_v35, %v2018_v22 }
 0x2c5   :  { %v510_v45 = vmul.f32 %v506_v38, %v2100_v37 }
 0x2c7   :  { %v2106_v40 = vpop.permute.xlu0 %479  ;;  %v489_v42 = vpop.permute.xlu1 %488 }
 0x2c8   :  { %v501_v43 = vsel %vm261_vm3, %v497_v39, %v2106_v40 }
 0x2c9   :  { %v505_v44 = vsel %vm464_vm5, %v501_v43, %v489_v42 }
 0x2ca   :  { %v509_v46 = vmul.f32 %v505_v44, %v2111_v41 }
 0x2cb   :  { %v2118_v47 = vpop.permute.xlu0 %473  ;;  %v2120_v48 = vpop.permute.xlu1 %471 }
 0x2cc   :  { %v1700_v50 = vpack.c.bf16 %v510_v45, %v509_v46  ;;  %v500_v53 = vsel %vm258_vm2, %v2118_v47, %v2022_v24  ;;  %v499_v54 = vsel %vm258_vm2, %v2120_v48, %v2028_v25 }
 0x2ce   :  { %1702 = vmatpush3.bf16.xpose.msk.msra.mxu1 %vm2124_vm6, %v1700_v50 }
 0x2cf   :  { %v2130_v51 = vpop.permute.xlu0 %483  ;;  %v2132_v52 = vpop.permute.xlu1 %481  ;;  %1703 = vmatprep.subr.bf16.mxu1 %v1863_v23 }
 0x2d0   :  { %v504_v57 = vsel %vm261_vm3, %v500_v53, %v2130_v51  ;;  %v503_v58 = vsel %vm261_vm3, %v499_v54, %v2132_v52  ;;  %v462_v54 = vsel %vm258_vm2, %v2018_v22, %v2086_v31 }
 0x2d3   :  { %v493_v59 = vpop.permute.xlu0 %492  ;;  %v456_v60 = vpop.permute.xlu1 %455 }
 0x2d4   :  { %v508_v61 = vsel %vm464_vm5, %v504_v57, %v493_v59  ;;  %v507_v62 = vsel %vm464_vm5, %v503_v58, %v456_v60  ;;  %v463_v57 = vsel %vm261_vm3, %v462_v54, %v456_v60 }
 0x2d5   :  { %v512_v63 = vmul.f32 %v508_v61, %v2144_v55  ;;  %v511_v0 = vmul.f32 %v507_v62, %v2149_v56 }
 0x2d7   :  { %v1704_v1 = vpack.c.bf16 %v512_v63, %v511_v0  ;;  %v2159_v2 = vpop.permute.xlu1 %761  ;;  %v2161_v3 = vpop.permute.xlu0 %778 }
 0x2d8   :  { %v807_v4 = vsel %vm258_vm2, %v2161_v3, %v2030_v26  ;;  %v772_v63 = vsel %vm258_vm2, %v2036_v27, %v2159_v2 }
 0x2d9   :  { %1706 = vmatpush3.bf16.xpose.msk.msra.mxu1 %vm2124_vm6, %v1704_v1  ;;  %v811_v8 = vsel %vm261_vm3, %v807_v4, %v2159_v2  ;;  %v627_v1 = vld [vmem:[%s2462_s2] sm:$0xff] }
 0x2da   :  { %1707 = vmatprep.subr.bf16.mxu1 %v1863_v23  ;;  %vm628_vm7 = vcmp.gt.f32.partialorder %v627_v1, 0.0 }
 0x2db   :  { %v800_v6 = vpop.permute.xlu0 %799  ;;  %v2169_v7 = vpop.permute.xlu1 %776 }
 0x2dc   :  { %v815_v9 = vsel %vm464_vm5, %v811_v8, %v800_v6  ;;  %v806_v10 = vsel %vm258_vm2, %v2169_v7, %v2036_v27 }
 0x2dd   :  { %v819_v16 = vmul.f32 %v815_v9, %v2100_v37  ;;  %v936_v9 = vld [vmem:[%s2462_s2 + $0x8] sm:$0xff] }
 0x2de   :  { %vm937_vm8 = vcmp.gt.f32.partialorder %v936_v9, 0.0 }
 0x2df   :  { %v2177_v11 = vpop.permute.xlu0 %788  ;;  %v798_v13 = vpop.permute.xlu1 %797 }
 0x2e0   :  { %v810_v14 = vsel %vm261_vm3, %v806_v10, %v2177_v11 }
 0x2e1   :  { %v814_v15 = vsel %vm464_vm5, %v810_v14, %v798_v13 }
 0x2e2   :  { %v818_v17 = vmul.f32 %v814_v15, %v2111_v41 }
 0x2e3   :  { %v2184_v18 = vpop.permute.xlu0 %782  ;;  %v2186_v19 = vpop.permute.xlu1 %780 }
 0x2e4   :  { %v1714_v20 = vpack.c.bf16 %v819_v16, %v818_v17  ;;  %v809_v36 = vsel %vm258_vm2, %v2184_v18, %v2038_v28  ;;  %v808_v38 = vsel %vm258_vm2, %v2186_v19, %v2044_v29 }
 0x2e6   :  { %1716 = vmatpush3.bf16.xpose.msk.msra.mxu0 %vm2124_vm6, %v1714_v20 }
 0x2e7   :  { %v2190_v33 = vpop.permute.xlu0 %792  ;;  %v2192_v34 = vpop.permute.xlu1 %790  ;;  %1717 = vmatprep.subr.bf16.mxu0 %v1863_v23 }
 0x2e8   :  { %v813_v39 = vsel %vm261_vm3, %v809_v36, %v2190_v33  ;;  %v812_v42 = vsel %vm261_vm3, %v808_v38, %v2192_v34 }
 0x2eb   :  { %v802_v43 = vpop.permute.xlu0 %801  ;;  %v766_v44 = vpop.permute.xlu1 %765 }
 0x2ec   :  { %v817_v45 = vsel %vm464_vm5, %v813_v39, %v802_v43  ;;  %v816_v46 = vsel %vm464_vm5, %v812_v42, %v766_v44  ;;  %v773_v0 = vsel %vm261_vm3, %v772_v63, %v766_v44 }
 0x2ed   :  { %v821_v50 = vmul.f32 %v817_v45, %v2144_v55  ;;  %v820_v53 = vmul.f32 %v816_v46, %v2149_v56 }
 0x2ef   :  { %v1718_v58 = vpack.c.bf16 %v821_v50, %v820_v53  ;;  %v460_v59 = vpop.permute.xlu1 %459  ;;  %v770_v62 = vpop.permute.xlu0 %769 }
 0x2f0   :  { %v465_v61 = vsel %vm464_vm5, %v463_v57, %v460_v59  ;;  %v774_v60 = vsel %vm464_vm5, %v773_v0, %v770_v62 }
 0x2f1   :  { %1591 = vmatmul.mubr.msk.f32.vlgmr.msra.gmra.mrb[4].mxu1 %vm77_vm0, %v465_v61  ;;  %1720 = vmatpush3.bf16.xpose.msk.msra.mxu0 %vm2124_vm6, %v1718_v58 }
 0x2f2   :  { %1601 = vmatprep.mubr.msk.f32.mxu1 %vm1865_vm4, %v1866_v30 }
 0x2f8   :  { %1613 = vmatmul.mubr.msk.f32.vlgmr.msra.gmra.mrb[8].mxu0 %vm77_vm0, %v774_v60 }
 0x3c4   :  { %v622_v49 = vpop.f32.mrb[4].mxu1 }
 0x3c5   :  { %v626_v4 = vmul.f32 0.35355338, %v622_v49  ;;  %v1592_v6 = vpop.f32.mrb[5].mxu1 }
 0x3c7   :  { %v629_v8 = vsel %vm628_vm7, -1e+09, %v626_v4 }
 0x3c8   :  { %635 = vrot.lane.b32.xlu0 %v629_v8, %s1860_s26  ;;  %631 = vrot.lane.b32.xlu1 %v629_v8, %s1857_s22 }
 0x3cb   :  { %v931_v10 = vpop.f32.mrb[8].mxu0 }
 0x3cc   :  { %v935_v13 = vmul.f32 0.35355338, %v931_v10  ;;  %v1614_v14 = vpop.f32.mrb[9].mxu0  ;;  %639 = vrot.lane.b32.xlu1 %v629_v8, %s1859_s25 }
 0x3ce   :  { %v938_v15 = vsel %vm937_vm8, -1e+09, %v935_v13 }
 0x3cf   :  { %940 = vrot.lane.b32.xlu0 %v938_v15, %s1857_s22 }
 0x3d0   :  { %944 = vrot.lane.b32.xlu1 %v938_v15, %s1860_s26 }
 0x3d3   :  { %948 = vrot.lane.b32.xlu0 %v938_v15, %s1859_s25 }
 0x43a   :  { %v632_v16 = vpop.permute.xlu1 %631  ;;  %v636_v20 = vpop.permute.xlu0 %635 }
 0x43b   :  { %v634_v17 = vmax.f32 %v629_v8, %v632_v16 }
 0x43d   :  { %v638_v36 = vmax.f32 %v634_v17, %v636_v20 }
 0x43e   :  { %v640_v38 = vpop.permute.xlu1 %639 }
 0x43f   :  { %v642_v39 = vmax.f32 %v638_v36, %v640_v38 }
 0x441   :  { %v941_v42 = vpop.permute.xlu0 %940  ;;  %647 = vrot.lane.b32.xlu0 %v642_v39, %s1864_s0  ;;  %644 = vrot.lane.b32.xlu1 %v642_v39, %s1858_s1 }
 0x442   :  { %v943_v43 = vmax.f32 %v938_v15, %v941_v42  ;;  %v945_v44 = vpop.permute.xlu1 %944 }
 0x444   :  { %v947_v45 = vmax.f32 %v943_v43, %v945_v44 }
 0x445   :  { %v949_v46 = vpop.permute.xlu0 %948  ;;  %650 = vrot.lane.b32.xlu1 %v642_v39, %s1867_s21 }
 0x446   :  { %v951_v50 = vmax.f32 %v947_v45, %v949_v46 }
 0x448   :  { %953 = vrot.lane.b32.xlu0 %v951_v50, %s1858_s1 }
 0x449   :  { %956 = vrot.lane.b32.xlu1 %v951_v50, %s1864_s0 }
 0x44c   :  { %959 = vrot.lane.b32.xlu0 %v951_v50, %s1867_s21 }
 0x4b3   :  { %v645_v53 = vpop.permute.xlu1 %644  ;;  %v648_v54 = vpop.permute.xlu0 %647 }
 0x4b4   :  { %v653_v57 = vsel %vm258_vm2, %v642_v39, %v645_v53 }
 0x4b5   :  { %v654_v58 = vsel %vm261_vm3, %v653_v57, %v648_v54 }
 0x4b7   :  { %v651_v59 = vpop.permute.xlu1 %650 }
 0x4b8   :  { %v655_v61 = vsel %vm464_vm5, %v654_v58, %v651_v59 }
 0x4b9   :  { %v656_v62 = vsub.f32 %v629_v8, %v655_v61 }
 0x4ba   :  { %v954_v63 = vpop.permute.xlu0 %953 }
 0x4bb   :  { %v657_v0 = vmul.f32 1.442695, %v656_v62  ;;  %v962_v60 = vsel %vm258_vm2, %v951_v50, %v954_v63  ;;  %v957_v1 = vpop.permute.xlu1 %956 }
 0x4bc   :  { %v963_v49 = vsel %vm261_vm3, %v962_v60, %v957_v1 }
 0x4bd   :  { %1817 = vpow2.f32 %v657_v0 }
 0x4be   :  { %v960_v4 = vpop.permute.xlu0 %959 }
 0x4bf   :  { %v964_v6 = vsel %vm464_vm5, %v963_v49, %v960_v4 }
 0x4c0   :  { %v965_v9 = vsub.f32 %v938_v15, %v964_v6 }
 0x4c2   :  { %v966_v10 = vmul.f32 1.442695, %v965_v9 }
 0x4c4   :  { %1819 = vpow2.f32 %v966_v10 }
 0x4c7   :  { %v2249_v13 = vpop.eup %1817 }
 0x4c8   :  { %664 = vrot.lane.b32.xlu0 %v2249_v13, %s1860_s26  ;;  %660 = vrot.lane.b32.xlu1 %v2249_v13, %s1857_s22 }
 0x4cc   :  { %668 = vrot.lane.b32.xlu1 %v2249_v13, %s1859_s25 }
 0x4ce   :  { %v2257_v8 = vpop.eup %1819 }
 0x4cf   :  { %969 = vrot.lane.b32.xlu0 %v2257_v8, %s1857_s22 }
 0x4d0   :  { %973 = vrot.lane.b32.xlu1 %v2257_v8, %s1860_s26 }
 0x4d3   :  { %977 = vrot.lane.b32.xlu0 %v2257_v8, %s1859_s25 }
 0x4d4   :  { %513 = vrot.lane.b32.xlu1 %v2018_v22, %s1860_s26 }
 0x4d7   :  { %515 = vrot.lane.b32.xlu0 %v2012_v21, %s1860_s26 }
 0x4d8   :  { %517 = vrot.lane.b32.xlu1 %v2028_v25, %s1860_s26 }
 0x4db   :  { %519 = vrot.lane.b32.xlu0 %v2022_v24, %s1860_s26 }
 0x4dc   :  { %822 = vrot.lane.b32.xlu1 %v2036_v27, %s1860_s26 }
 0x4df   :  { %824 = vrot.lane.b32.xlu0 %v2030_v26, %s1860_s26 }
 0x4e3   :  { %826 = vrot.lane.b32.xlu0 %v2044_v29, %s1860_s26 }
 0x53a   :  { %v661_v14 = vpop.permute.xlu1 %660  ;;  %v665_v16 = vpop.permute.xlu0 %664 }
 0x53b   :  { %v663_v15 = vadd.f32 %v2249_v13, %v661_v14 }
 0x53d   :  { %v667_v17 = vadd.f32 %v665_v16, %v663_v15 }
 0x53e   :  { %v669_v20 = vpop.permute.xlu1 %668 }
 0x53f   :  { %v671_v36 = vadd.f32 %v669_v20, %v667_v17 }
 0x541   :  { %1821 = vrcp.f32 %v671_v36  ;;  %v970_v38 = vpop.permute.xlu0 %969 }
 0x542   :  { %v972_v39 = vadd.f32 %v2257_v8, %v970_v38  ;;  %v974_v42 = vpop.permute.xlu1 %973 }
 0x544   :  { %v976_v43 = vadd.f32 %v974_v42, %v972_v39 }
 0x545   :  { %v978_v44 = vpop.permute.xlu0 %977 }
 0x546   :  { %v980_v45 = vadd.f32 %v978_v44, %v976_v43  ;;  %v514_v46 = vpop.permute.xlu1 %513 }
 0x547   :  { %v525_v50 = vsel %vm258_vm2, %v514_v46, %v2093_v35 }
 0x548   :  { %1823 = vrcp.f32 %v980_v45  ;;  %v529_v53 = vsel %vm261_vm3, %v525_v50, %v2018_v22 }
 0x549   :  { %v516_v54 = vpop.permute.xlu0 %515  ;;  %v533_v57 = vsel %vm464_vm5, %v529_v53, %v2106_v40 }
 0x54a   :  { %v526_v58 = vsel %vm258_vm2, %v516_v54, %v2088_v32  ;;  %v518_v59 = vpop.permute.xlu1 %517  ;;  %v537_v32 = vmul.f32 %v533_v57, %v2111_v41  ;;  %v35_v54 = vld [vmem:[%s2463_s3 + $0x38] sm:$0xff] }
 0x54b   :  { %v1822_v61 = vpop.eup %1821  ;;  %v530_v62 = vsel %vm261_vm3, %v526_v58, %v2012_v21  ;;  %v527_v63 = vsel %vm258_vm2, %v518_v59, %v2120_v48 }
 0x54c   :  { %v534_v35 = vsel %vm464_vm5, %v530_v62, %v2086_v31  ;;  %v531_v22 = vsel %vm261_vm3, %v527_v63, %v2028_v25  ;;  %677 = vrot.lane.b32.xlu0 %v1822_v61, %s1864_s0  ;;  %674 = vrot.lane.b32.xlu1 %v1822_v61, %s1858_s1  ;;  %v1449_v62 = vld [vmem:[%s2465_s5 + $0x2] ss:$0 sm:$0xff] }
 0x54d   :  { %v538_v40 = vmul.f32 %v534_v35, %v2100_v37  ;;  %v520_v0 = vpop.permute.xlu0 %519  ;;  %v535_v21 = vsel %vm464_vm5, %v531_v22, %v2132_v52 }
 0x54e   :  { %v528_v48 = vsel %vm258_vm2, %v520_v0, %v2118_v47  ;;  %v823_v60 = vpop.permute.xlu1 %822  ;;  %v539_v52 = vmul.f32 %v535_v21, %v2149_v56 }
 0x54f   :  { %v532_v31 = vsel %vm261_vm3, %v528_v48, %v2022_v24  ;;  %v834_v25 = vsel %vm258_vm2, %v823_v60, %v2169_v7  ;;  %v1708_v1 = vpack.c.bf16 %v538_v40, %v537_v32 }
 0x550   :  { %v536_v49 = vsel %vm464_vm5, %v532_v31, %v2130_v51  ;;  %v838_v4 = vsel %vm261_vm3, %v834_v25, %v2036_v27  ;;  %680 = vrot.lane.b32.xlu1 %v1822_v61, %s1867_s21 }
 0x551   :  { %v540_v47 = vmul.f32 %v536_v49, %v2144_v55  ;;  %v825_v6 = vpop.permute.xlu0 %824  ;;  %1709 = vmatpush3.bf16.msra.mxu1 %v1708_v1  ;;  %v842_v24 = vsel %vm464_vm5, %v838_v4, %v2177_v11 }
 0x552   :  { %v1824_v9 = vpop.eup %1823  ;;  %v835_v7 = vsel %vm258_vm2, %v825_v6, %v2161_v3  ;;  %1710 = vmatprep.subr.bf16.mxu1 %v1863_v23  ;;  %v846_v14 = vmul.f32 %v842_v24, %v2111_v41 }
 0x553   :  { %v839_v27 = vsel %vm261_vm3, %v835_v7, %v2030_v26  ;;  %983 = vrot.lane.b32.xlu0 %v1824_v9, %s1858_s1  ;;  %v1711_v51 = vpack.c.bf16 %v540_v47, %v539_v52  ;;  %v54_v7 = vld [vmem:[%s2464_s4 + $0x30] sm:$0xff] }
 0x554   :  { %v843_v10 = vsel %vm464_vm5, %v839_v27, %v2159_v2  ;;  %828 = vrot.lane.b32.xlu1 %v2038_v28, %s1860_s26  ;;  %v55_v27 = vld [vmem:[%s2464_s4 + $0x38] sm:$0xff] }
 0x555   :  { %v847_v11 = vmul.f32 %v843_v10, %v2100_v37  ;;  %1712 = vmatpush3.bf16.msra.mxu1 %v1711_v51  ;;  %v827_v26 = vpop.permute.xlu0 %826  ;;  %v1739_v51 = vpack.c.bf16 %v55_v27, %v54_v7  ;;  %v36_v10 = vld [vmem:[%s2463_s3 + $0x40] sm:$0xff] }
 0x556   :  { %1721 = vmatprep.subr.bf16.mxu1 %v1863_v23  ;;  %v836_v17 = vsel %vm258_vm2, %v827_v26, %v2186_v19  ;;  %v39_v26 = vld [vmem:[%s2463_s3 + $0x58] sm:$0xff] }
 0x557   :  { %989 = vrot.lane.b32.xlu0 %v1824_v9, %s1867_s21  ;;  %v1722_v3 = vpack.c.bf16 %v847_v11, %v846_v14  ;;  %v840_v36 = vsel %vm261_vm3, %v836_v17, %v2044_v29  ;;  %v37_v14 = vld [vmem:[%s2463_s3 + $0x48] sm:$0xff]  ;;  %v38_v11 = vld [vmem:[%s2463_s3 + $0x50] sm:$0xff] }
 0x558   :  { %986 = vrot.lane.b32.xlu1 %v1824_v9, %s1864_s0  ;;  %v844_v43 = vsel %vm464_vm5, %v840_v36, %v2192_v34 }
 0x5be   :  { %v675_v15 = vpop.permute.xlu1 %674  ;;  %v678_v16 = vpop.permute.xlu0 %677 }
 0x5bf   :  { %v683_v2 = vsel %vm258_vm2, %v1822_v61, %v675_v15  ;;  %v1747_v15 = vpack.c.bf16 %v39_v26, %v38_v11 }
 0x5c0   :  { %v684_v41 = vsel %vm261_vm3, %v683_v2, %v678_v16  ;;  %v40_v16 = vld [vmem:[%s2463_s3 + $0x60] sm:$0xff]  ;;  %v41_v2 = vld [vmem:[%s2463_s3 + $0x68] sm:$0xff] }
 0x5c1   :  { %v1751_v17 = vpack.c.bf16 %v41_v2, %v40_v16 }
 0x5c2   :  { %v681_v20 = vpop.permute.xlu1 %680 }
 0x5c3   :  { %v685_v37 = vsel %vm464_vm5, %v684_v41, %v681_v20 }
 0x5c4   :  { %v686_v38 = vmul.f32 %v2249_v13, %v685_v37  ;;  %v848_v13 = vmul.f32 %v844_v43, %v2149_v56  ;;  %v34_v56 = vld [vmem:[%s2463_s3 + $0x30] sm:$0xff]  ;;  %v1452_v43 = vld [vmem:[%s2465_s5 + $0x3] ss:$0 sm:$0xff] }
 0x5c5   :  { %v984_v39 = vpop.permute.xlu0 %983 }
 0x5c6   :  { %1602 = vmatmul.mubr.msk.f32.vlgmr.msra.gmra.mrb[6].mxu1 %vm77_vm0, %v686_v38  ;;  %v829_v42 = vpop.permute.xlu1 %828  ;;  %v992_v45 = vsel %vm258_vm2, %v1824_v9, %v984_v39  ;;  %v53_v9 = vld [vmem:[%s2464_s4 + $0x28] sm:$0xff] }
 0x5c7   :  { %1723 = vmatpush3.bf16.msra.mxu1 %v1722_v3  ;;  %v837_v19 = vsel %vm258_vm2, %v829_v42, %v2184_v18  ;;  %1623 = vmatprep.mubr.msk.f32.mxu1 %vm1865_vm4, %v1866_v30  ;;  %v1743_v3 = vpack.c.bf16 %v37_v14, %v36_v10 }
 0x5c8   :  { %v841_v44 = vsel %vm261_vm3, %v837_v19, %v2038_v28  ;;  %1724 = vmatprep.subr.bf16.mxu1 %v1863_v23  ;;  %v32_v23 = vld [vmem:[%s2463_s3 + $0x20] sm:$0xff] }
 0x5c9   :  { %v845_v29 = vsel %vm464_vm5, %v841_v44, %v2190_v33  ;;  %v990_v50 = vpop.permute.xlu0 %989 }
 0x5ca   :  { %v849_v34 = vmul.f32 %v845_v29, %v2144_v55  ;;  %v987_v46 = vpop.permute.xlu1 %986  ;;  %v33_v55 = vld [vmem:[%s2463_s3 + $0x28] sm:$0xff] }
 0x5cb   :  { %v993_v18 = vsel %vm261_vm3, %v992_v45, %v987_v46  ;;  %v1727_v33 = vpack.c.bf16 %v33_v55, %v32_v23 }
 0x5cc   :  { %v994_v30 = vsel %vm464_vm5, %v993_v18, %v990_v50  ;;  %v1725_v53 = vpack.c.bf16 %v849_v34, %v848_v13  ;;  %v1453_v13 = vld [vmem:[%s2465_s5 + $0x4] ss:$0 sm:$0xff]  ;;  %v42_v18 = vld [vmem:[%s2463_s3 + $0x70] sm:$0xff] }
 0x5cd   :  { %v995_v28 = vmul.f32 %v2257_v8, %v994_v30  ;;  %v1731_v8 = vpack.c.bf16 %v35_v54, %v34_v56  ;;  %1728 = vmatprep.subr.bf16.mxu0 %v1727_v33  ;;  %v43_v30 = vld [vmem:[%s2463_s3 + $0x78] sm:$0xff]  ;;  %v1457_v54 = vld [vmem:[%s2465_s5 + $0x6] ss:$0 sm:$0xff] }
 0x5ce   :  { %1726 = vmatpush3.bf16.msra.mxu1 %v1725_v53  ;;  %1730 = vmatpush3.bf16.msra.mxu0 %v1727_v33  ;;  %v1755_v53 = vpack.c.bf16 %v43_v30, %v42_v18 }
 0x5cf   :  { %1732 = vmatprep.subr.bf16.mxu0 %v1731_v8 }
 0x5d1   :  { %1624 = vmatmul.mubr.msk.f32.vlgmr.msra.gmra.mrb[8].mxu1 %vm77_vm0, %v995_v28  ;;  %v1454_v28 = vld [vmem:[%s2465_s5 + $0x5] ss:$0 sm:$0xff] }
 0x5d2   :  { %1734 = vmatpush3.bf16.msra.mxu0 %v1731_v8 }
 0x5d3   :  { %1744 = vmatprep.subr.bf16.mxu0 %v1743_v3 }
 0x699   :  { %v756_v57 = vpop.f32.mrb[6].mxu1 }
 0x69a   :  { %v1603_v58 = vpop.f32.mrb[7].mxu1  ;;  %1634 = vmatprep.mubr.msk.f32.mxu0 %vm77_vm0, %v756_v57 }
 0x6a4   :  { %v1065_v59 = vpop.f32.mrb[8].mxu1 }
 0x6a5   :  { %v1625_v61 = vpop.f32.mrb[9].mxu1  ;;  %1635 = vmatmul.mubr.msk.f32.vlgmr.msra.gmra.mrb[10].mxu0 %vm77_vm0, %v1065_v59 }
 0x6a6   :  { %1746 = vmatpush3.bf16.msra.mxu0 %v1743_v3 }
 0x6a7   :  { %1748 = vmatprep.subr.bf16.mxu0 %v1747_v15 }
 0x6aa   :  { %1750 = vmatpush3.bf16.msra.mxu0 %v1747_v15 }
 0x6ab   :  { %1752 = vmatprep.subr.bf16.mxu0 %v1751_v17 }
 0x6ae   :  { %1754 = vmatpush3.bf16.msra.mxu0 %v1751_v17 }
 0x6af   :  { %1756 = vmatprep.subr.bf16.mxu0 %v1755_v53 }
 0x6b2   :  { %1758 = vmatpush3.bf16.msra.mxu0 %v1755_v53 }
 0x778   :  { %v1636_v63 = vpop.f32.mrb[10].mxu0 }
 0x779   :  { %v1151_v35 = vadd.f32 %v1636_v63, %v1449_v62  ;;  %v1145_v22 = vpop.f32.mrb[11].mxu0 }
 0x77a   :  { %v1146_v32 = vadd.f32 %v1449_v62, %v1145_v22 }
 0x77b   :  { %v1155_v40 = vadd.f32 %v1151_v35, %v1939_v12 }
 0x77c   :  { %v1154_v0 = vadd.f32 %v1146_v32, %v1920_v5  ;;  %v52_v5 = vld [vmem:[%s2464_s4 + $0x20] sm:$0xff] }
 0x77d   :  { %v1159_v21 = vsel %vm77_vm0, %v1155_v40, 0.0  ;;  %v1735_v24 = vpack.c.bf16 %v53_v9, %v52_v5  ;;  %v1460_v9 = vld [vmem:[%s2465_s5 + $0x7] ss:$0 sm:$0xff] }
 0x77e   :  { %1160 = vadd.xlane.f32.xlu0 %v1159_v21  ;;  %v1156_v48 = vsel %vm77_vm0, %v1154_v0, 0.0 }
 0x77f   :  { %1157 = vadd.xlane.f32.xlu1 %v1156_v48  ;;  %1736 = vmatprep.subr.bf16.mxu1 %v1735_v24 }
 0x780   :  { %1738 = vmatpush3.bf16.msra.mxu1 %v1735_v24 }
 0x781   :  { %1740 = vmatprep.subr.bf16.mxu1 %v1739_v51 }
 0x784   :  { %1742 = vmatpush3.bf16.msra.mxu1 %v1739_v51  ;;  %v1461_v51 = vld [vmem:[%s2465_s5 + $0x8] ss:$0 sm:$0xff] }
 0x80b   :  { %v1161_v60 = vpop.xlane.xlu0 %1160 }
 0x80c   :  { %v1164_v31 = vmul.f32 0.03125, %v1161_v60  ;;  %v1158_v25 = vpop.xlane.xlu1 %1157 }
 0x80d   :  { %v1163_v1 = vmul.f32 0.03125, %v1158_v25 }
 0x80e   :  { %v1166_v49 = vsub.f32 %v1155_v40, %v1164_v31 }
 0x80f   :  { %v1165_v4 = vsub.f32 %v1154_v0, %v1163_v1 }
 0x810   :  { %v1168_v52 = vmul.f32 %v1166_v49, %v1166_v49 }
 0x811   :  { %v1167_v47 = vmul.f32 %v1165_v4, %v1165_v4 }
 0x812   :  { %v1172_v6 = vsel %vm77_vm0, %v1168_v52, 0.0 }
 0x813   :  { %1173 = vadd.xlane.f32.xlu1 %v1172_v6  ;;  %v1169_v12 = vsel %vm77_vm0, %v1167_v47, 0.0 }
 0x814   :  { %1170 = vadd.xlane.f32.xlu0 %v1169_v12 }
 0x8a0   :  { %v1174_v41 = vpop.xlane.xlu1 %1173 }
 0x8a1   :  { %v1176_v20 = vmul.f32 0.03125, %v1174_v41  ;;  %v1171_v37 = vpop.xlane.xlu0 %1170 }
 0x8a2   :  { %v1175_v36 = vmul.f32 0.03125, %v1171_v37 }
 0x8a3   :  { %v1178_v38 = vadd.f32 1e-05, %v1176_v20 }
 0x8a4   :  { %v1177_v39 = vadd.f32 1e-05, %v1175_v36 }
 0x8a5   :  { %1825 = vrsqrt.f32 %v1178_v38 }
 0x8a6   :  { %1827 = vrsqrt.f32 %v1177_v39 }
 0x8af   :  { %v1826_v42 = vpop.eup %1825 }
 0x8b0   :  { %v1828_v19 = vpop.eup %1827  ;;  %v1182_v44 = vmul.f32 %v1826_v42, %v1166_v49 }
 0x8b1   :  { %v1181_v29 = vmul.f32 %v1828_v19, %v1165_v4 }
 0x8b2   :  { %v1188_v45 = vmul.f32 %v1452_v43, %v1182_v44 }
 0x8b3   :  { %v1187_v34 = vmul.f32 %v1452_v43, %v1181_v29 }
 0x8b4   :  { %v1194_v50 = vadd.f32 %v1453_v13, %v1188_v45 }
 0x8b5   :  { %v1193_v46 = vadd.f32 %v1453_v13, %v1187_v34 }
 0x8b7   :  { %1645 = vmatprep.mubr.msk.f32.mxu1 %vm77_vm0, %v1193_v46 }
 0x8b8   :  { %1646 = vmatmul.mubr.msk.f32.vlgmr.msra.gmra.mrb[10].mxu1 %vm77_vm0, %v1194_v50 }
 0x98b   :  { %v1647_v23 = vpop.f32.mrb[10].mxu1 }
 0x98c   :  { %v1271_v55 = vpop.f32.mrb[11].mxu1  ;;  %v1277_v33 = vadd.f32 %v1647_v23, %v1454_v28 }
 0x98d   :  { %v1272_v56 = vadd.f32 %v1454_v28, %v1271_v55 }
 0x98f   :  { %1664 = vmatprep.mubr.msk.f32.mxu0 %vm320_vm1, %v1272_v56 }
 0x990   :  { %1665 = vmatmul.mubr.msk.f32.vlgmr.msra.gmra.mrb[12].mxu0 %vm320_vm1, %v1277_v33 }
 0xa63   :  { %v1666_v8 = vpop.f32.mrb[12].mxu0 }
 0xa64   :  { %v1362_v57 = vadd.f32 %v1666_v8, %v1457_v54  ;;  %v1356_v58 = vpop.f32.mrb[13].mxu0 }
 0xa65   :  { %v1357_v59 = vadd.f32 %v1457_v54, %v1356_v58 }
 0xa66   :  { %v1366_v61 = vadd.f32 %v1362_v57, %v1194_v50 }
 0xa67   :  { %v1365_v62 = vadd.f32 %v1357_v59, %v1193_v46 }
 0xa68   :  { %v1370_v63 = vsel %vm77_vm0, %v1366_v61, 0.0 }
 0xa69   :  { %1371 = vadd.xlane.f32.xlu1 %v1370_v63  ;;  %v1367_v35 = vsel %vm77_vm0, %v1365_v62, 0.0 }
 0xa6a   :  { %1368 = vadd.xlane.f32.xlu0 %v1367_v35 }
 0xaf6   :  { %v1372_v22 = vpop.xlane.xlu1 %1371 }
 0xaf7   :  { %v1374_v32 = vmul.f32 0.03125, %v1372_v22  ;;  %v1369_v40 = vpop.xlane.xlu0 %1368 }
 0xaf8   :  { %v1373_v0 = vmul.f32 0.03125, %v1369_v40 }
 0xaf9   :  { %v1376_v21 = vsub.f32 %v1366_v61, %v1374_v32 }
 0xafa   :  { %v1375_v48 = vsub.f32 %v1365_v62, %v1373_v0 }
 0xafb   :  { %v1378_v60 = vmul.f32 %v1376_v21, %v1376_v21 }
 0xafc   :  { %v1377_v31 = vmul.f32 %v1375_v48, %v1375_v48 }
 0xafd   :  { %v1382_v25 = vsel %vm77_vm0, %v1378_v60, 0.0 }
 0xafe   :  { %1383 = vadd.xlane.f32.xlu1 %v1382_v25  ;;  %v1379_v1 = vsel %vm77_vm0, %v1377_v31, 0.0 }
 0xaff   :  { %1380 = vadd.xlane.f32.xlu0 %v1379_v1 }
 0xb8b   :  { %v1384_v49 = vpop.xlane.xlu1 %1383 }
 0xb8c   :  { %v1386_v4 = vmul.f32 0.03125, %v1384_v49  ;;  %v1381_v52 = vpop.xlane.xlu0 %1380 }
 0xb8d   :  { %v1385_v47 = vmul.f32 0.03125, %v1381_v52 }
 0xb8e   :  { %v1388_v6 = vadd.f32 1e-05, %v1386_v4 }
 0xb8f   :  { %v1387_v12 = vadd.f32 1e-05, %v1385_v47 }
 0xb90   :  { %1829 = vrsqrt.f32 %v1388_v6 }
 0xb91   :  { %1831 = vrsqrt.f32 %v1387_v12 }
 0xb9a   :  { %v1830_v5 = vpop.eup %1829 }
 0xb9b   :  { %v1832_v24 = vpop.eup %1831  ;;  %v1392_v7 = vmul.f32 %v1830_v5, %v1376_v21 }
 0xb9c   :  { %v1391_v27 = vmul.f32 %v1832_v24, %v1375_v48 }
 0xb9d   :  { %v1398_v10 = vmul.f32 %v1460_v9, %v1392_v7 }
 0xb9e   :  { %v1397_v14 = vmul.f32 %v1460_v9, %v1391_v27 }
 0xb9f   :  { %v1404_v11 = vadd.f32 %v1461_v51, %v1398_v10 }
 0xba0   :  { %v1403_v3 = vadd.f32 %v1461_v51, %v1397_v14 }
 0xba1   :  { %1406 = vst.msk [vmem:[#allocation2 + $0x8] sm:$0xff] %vm77_vm0, %v1404_v11 }
 0xba2   :  { %1405 = vst.msk [vmem:[#allocation2] sm:$0xff] %vm77_vm0, %v1403_v3 }
 0xba3   :  { %1844 = shalt.err (!%p1841_p4)
}
 0xba4   :  { %s1845_s9 = scalar_lea.hbm %s2466_s6, 256 }
 0xba5   :  { %p1846_p5 = scmp.ne.s32.totalorder %s2466_s6, %s1845_s9  ;;  %p1849_p6 = scmp.lt.u32.totalorder %s1845_s9, %s2466_s6 }
 0xba7   :  { %p1851_p7 = pnand %p1849_p6, %p1846_p5 }
 0xba9   :  { %1854 = shalt.err (!%p1851_p7)
}
 0xbaa   :  { %s1869_s2 = smov 128  }
 0xbab   :  { %1418 = dma.vmem_to_hbm [thread:$0]  %s1413_s30, 256, %s2466_s6, [#allocation3], %s1869_s2, %s1869_s2, %s1858_s1  }
 0xbac   :  { %1855 = dma.done.wait [#allocation3], 256  }
 0xbad   :  { %1856 = vsyncadd [#allocation3], 4294967040 }
 0xbae   :  { %1422 = vsyncpa [#allocation3], 1 }

</bundles_post_ra>
